<compile_context>
chip_gen: v5e
topology: v5e:2x2
jax: 0.10.0
libtpu: 0.0.40
codegen_flags: <defaults>
</compile_context>

<pallas_src>
import functools

import jax
import jax.numpy as jnp
from jax.experimental import pallas as pl
from jax.experimental.pallas import tpu as pltpu

LANES = 128
MAX_BLOCK_ROWS = 2048   # (2048, 128) f32 = 1 MiB / input / pipeline buffer
NUM_PARALLEL = 2        # leading "parallel" grid axis (v7x megacore; no-op elsewhere)


def _round_up(x, m):
    return ((x + m - 1) // m) * m


def _focal_kernel(pred_ref, gt_ref, out_ref, *, n_valid):
    """Accumulate per-lane partial sums for one parallel block.

    out_ref view: (3, 128) f32, resident across the inner ("arbitrary") axis.
        row 0: sum(pos_loss), row 1: sum(neg_loss), row 2: sum(pos_inds)
    """
    p = pl.program_id(0)
    i = pl.program_id(1)
    t_inner = pl.num_programs(1)
    block_rows = pred_ref.shape[0]

    pred = pred_ref[...].astype(jnp.float32)
    gt = gt_ref[...].astype(jnp.float32)

    # Flat-index validity mask: handles the partial tail tile and any
    # duplicated (clamped) trailing block of the last parallel chunk.
    # (Assumes total element count < 2^31, i.e. int32 flat indices suffice.)
    b = p * t_inner + i                                   # logical row-tile id
    row = jax.lax.broadcasted_iota(jnp.int32, pred.shape, 0)
    lane = jax.lax.broadcasted_iota(jnp.int32, pred.shape, 1)
    flat = (b * block_rows + row) * LANES + lane
    valid = flat < n_valid

    pos_mask = (gt == 1.0) & valid
    neg_mask = (gt < 1.0) & valid
    pos_inds = pos_mask.astype(jnp.float32)
    neg_inds = neg_mask.astype(jnp.float32)

    # Safe values for invalid lanes so log / pow stay finite (0 * inf -> NaN).
    pred_s = jnp.where(valid, pred, 0.5)
    gt_s = jnp.where(valid, gt, 2.0)

    one_m_pred = 1.0 - pred_s
    # Single EUP log per element: log(pred) for positives, log(1-pred) else.
    log_val = jnp.log(jnp.where(pos_mask, pred_s, one_m_pred))

    t = 1.0 - gt_s
    t2 = t * t
    neg_weights = t2 * t2                                  # (1 - gt) ** 4

    pos_loss = log_val * (one_m_pred * one_m_pred) * pos_inds
    neg_loss = log_val * (pred_s * pred_s) * neg_weights * neg_inds

    @pl.when(i == 0)
    def _():
        out_ref[...] = jnp.zeros_like(out_ref)

    # Sublane-only reductions (VPU-friendly); cross-lane combine happens in JAX.
    out_ref[0:1, :] += jnp.sum(pos_loss, axis=0, keepdims=True)
    out_ref[1:2, :] += jnp.sum(neg_loss, axis=0, keepdims=True)
    out_ref[2:3, :] += jnp.sum(pos_inds, axis=0, keepdims=True)


def focal_loss(pred, gt):
    """Reproduces FocalLoss.forward(pred, gt) -> scalar float32."""
    assert pred.shape == gt.shape
    n = 1
    for d in pred.shape:
        n *= d

    # Flatten in the caller's native dtype (bf16 inputs stay bf16 -> half the
    # HBM read bytes); casting to f32 happens inside the kernel.
    flat_pred = pred.reshape(-1)
    flat_gt = gt.reshape(-1)

    rem = (-n) % LANES
    if rem:
        # Rare (heatmaps are usually lane-aligned): minimal pad to a multiple
        # of 128 so the lane-dense reshape is legal; padded lanes are masked
        # out in-kernel, so the pad value is irrelevant.
        flat_pred = jnp.pad(flat_pred, (0, rem))
        flat_gt = jnp.pad(flat_gt, (0, rem))
    rows = (n + rem) // LANES

    pred2d = flat_pred.reshape(rows, LANES)
    gt2d = flat_gt.reshape(rows, LANES)

    block_rows = min(MAX_BLOCK_ROWS, _round_up(rows, 8))
    nt = pl.cdiv(rows, block_rows)           # total row tiles
    p_par = min(NUM_PARALLEL, nt)            # parallel chunks
    t_inner = pl.cdiv(nt, p_par)             # tiles per parallel chunk

    def in_map(p, i):
        # Clamp so a duplicated trailing block (when nt is not a multiple of
        # p_par) stays in bounds; its contribution is fully masked in-kernel.
        return (jnp.minimum(p * t_inner + i, nt - 1), 0)

    parts = pl.pallas_call(
        functools.partial(_focal_kernel, n_valid=n),
        out_shape=jax.ShapeDtypeStruct((p_par, 3, LANES), jnp.float32),
        grid_spec=pltpu.PrefetchScalarGridSpec(
            num_scalar_prefetch=0,
            grid=(p_par, t_inner),
            in_specs=[
                pl.BlockSpec((block_rows, LANES), in_map),
                pl.BlockSpec((block_rows, LANES), in_map),
            ],
            # Leading dim squeezed: kernel sees a (3, 128) accumulator per p.
            out_specs=pl.BlockSpec((None, 3, LANES), lambda p, i: (p, 0, 0)),
        ),
        compiler_params=pltpu.CompilerParams(
            dimension_semantics=("parallel", "arbitrary"),
        ),
    )(pred2d, gt2d)

    sums = jnp.sum(parts, axis=(0, 2))       # (3,) -> pos_sum, neg_sum, num_pos
    pos_sum, neg_sum, num_pos = sums[0], sums[1], sums[2]

    # loss = -neg_loss                      if num_pos == 0
    #      = -(pos_loss + neg_loss)/num_pos otherwise
    safe_np = jnp.where(num_pos == 0.0, 1.0, num_pos)
    return jnp.where(num_pos == 0.0, -neg_sum, -(pos_sum + neg_sum) / safe_np)


def focal_loss_ref(pred, gt):
    """Plain-JAX reference mirroring the PyTorch module."""
    pred = pred.astype(jnp.float32)
    gt = gt.astype(jnp.float32)
    pos_inds = (gt == 1.0).astype(jnp.float32)
    neg_inds = (gt < 1.0).astype(jnp.float32)
    neg_weights = (1.0 - gt) ** 4
    pos_loss = jnp.log(pred) * (1.0 - pred) ** 2 * pos_inds
    neg_loss = jnp.log(1.0 - pred) * pred ** 2 * neg_weights * neg_inds
    num_pos = pos_inds.sum()
    pos_loss = pos_loss.sum()
    neg_loss = neg_loss.sum()
    safe_np = jnp.where(num_pos == 0.0, 1.0, num_pos)
    return jnp.where(num_pos == 0.0, -neg_loss, -(pos_loss + neg_loss) / safe_np)


if __name__ == "__main__":
    key = jax.random.PRNGKey(0)
    k_pred, k_gt, k_pred2, k_gt2 = jax.random.split(key, 4)

    # --- Test 1: NCHW heatmaps with exact-1.0 peaks (num_pos > 0 branch) ---
    B, C, H, W = 2, 4, 16, 16
    pred = jax.nn.sigmoid(jax.random.normal(k_pred, (B, C, H, W), jnp.float32))
    pred = jnp.clip(pred, 1e-4, 1.0 - 1e-4)
    gt_raw = jax.random.uniform(k_gt, (B, C, H, W), jnp.float32) * 0.98
    gt = gt_raw.at[:, :, 4, 4].set(1.0).at[:, :, 10, 7].set(1.0)

    out = focal_loss(pred, gt)
    jax.block_until_ready(out)
    ref = focal_loss_ref(pred, gt)
    assert jnp.allclose(out, ref, rtol=1e-5, atol=1e-5), (out, ref)

    # --- Test 2: non-lane-aligned shape, no peaks (num_pos == 0 branch) ---
    pred2 = jax.nn.sigmoid(jax.random.normal(k_pred2, (1, 3, 10, 10), jnp.float32))
    pred2 = jnp.clip(pred2, 1e-4, 1.0 - 1e-4)
    gt2 = jax.random.uniform(k_gt2, (1, 3, 10, 10), jnp.float32) * 0.98

    out2 = focal_loss(pred2, gt2)
    jax.block_until_ready(out2)
    ref2 = focal_loss_ref(pred2, gt2)
    assert jnp.allclose(out2, ref2, rtol=1e-5, atol=1e-5), (out2, ref2)

    print("KERNEL_OK")
</pallas_src>

<mosaic_0001>
module attributes {stable_mosaic.version = 11 : i64} {
  func.func @_focal_kernel(%arg0: i32, %arg1: i32, %arg2: memref<16x128xf32, #tpu.memory_space<vmem>>, %arg3: memref<16x128xf32, #tpu.memory_space<vmem>>, %arg4: memref<1x3x128xf32, #tpu.memory_space<vmem>>) attributes {dimension_semantics = [#tpu.dimension_semantics<parallel>, #tpu.dimension_semantics<arbitrary>], iteration_bounds = array<i64: 1, 1>, scalar_prefetch = 0 : i64, scratch_operands = 0 : i64, tpu.core_type = #tpu.core_type<tc>, window_params = [{transform_indices = @transform_0, window_bounds = array<i64: 16, 128>}, {transform_indices = @transform_1, window_bounds = array<i64: 16, 128>}, {transform_indices = @transform_2, window_bounds = array<i64: 1, 3, 128>}]} {
    %c0 = arith.constant 0 : index
    %c0_0 = arith.constant 0 : index
    %0 = vector.load %arg2[%c0, %c0_0] : memref<16x128xf32, #tpu.memory_space<vmem>>, vector<16x128xf32>
    %c0_1 = arith.constant 0 : index
    %c0_2 = arith.constant 0 : index
    %1 = vector.load %arg3[%c0_1, %c0_2] : memref<16x128xf32, #tpu.memory_space<vmem>>, vector<16x128xf32>
    %c1_i32 = arith.constant 1 : i32
    %2 = arith.muli %arg0, %c1_i32 : i32
    %3 = arith.addi %2, %arg1 : i32
    %4 = tpu.iota {dimensions = array<i32: 0>} : vector<16x128xi32>
    %5 = tpu.iota {dimensions = array<i32: 1>} : vector<16x128xi32>
    %c16_i32 = arith.constant 16 : i32
    %6 = arith.muli %3, %c16_i32 : i32
    %7 = vector.broadcast %6 : i32 to vector<16x128xi32>
    %8 = arith.addi %7, %4 : vector<16x128xi32>
    %c128_i32 = arith.constant 128 : i32
    %9 = vector.broadcast %c128_i32 : i32 to vector<16x128xi32>
    %10 = arith.muli %8, %9 : vector<16x128xi32>
    %11 = arith.addi %10, %5 : vector<16x128xi32>
    %c2048_i32 = arith.constant 2048 : i32
    %12 = vector.broadcast %c2048_i32 : i32 to vector<16x128xi32>
    %13 = arith.cmpi slt, %11, %12 : vector<16x128xi32>
    %cst = arith.constant 1.000000e+00 : f32
    %14 = vector.broadcast %cst : f32 to vector<16x128xf32>
    %15 = arith.cmpf oeq, %1, %14 : vector<16x128xf32>
    %16 = arith.andi %15, %13 : vector<16x128xi1>
    %cst_3 = arith.constant 1.000000e+00 : f32
    %17 = vector.broadcast %cst_3 : f32 to vector<16x128xf32>
    %18 = arith.cmpf olt, %1, %17 : vector<16x128xf32>
    %19 = arith.andi %18, %13 : vector<16x128xi1>
    %20 = arith.extui %16 : vector<16x128xi1> to vector<16x128xi32>
    %21 = arith.sitofp %20 : vector<16x128xi32> to vector<16x128xf32>
    %22 = arith.extui %19 : vector<16x128xi1> to vector<16x128xi32>
    %23 = arith.sitofp %22 : vector<16x128xi32> to vector<16x128xf32>
    %cst_4 = arith.constant 5.000000e-01 : f32
    %24 = vector.broadcast %cst_4 : f32 to vector<16x128xf32>
    %25 = arith.select %13, %0, %24 : vector<16x128xi1>, vector<16x128xf32>
    %cst_5 = arith.constant 2.000000e+00 : f32
    %26 = vector.broadcast %cst_5 : f32 to vector<16x128xf32>
    %27 = arith.select %13, %1, %26 : vector<16x128xi1>, vector<16x128xf32>
    %cst_6 = arith.constant 1.000000e+00 : f32
    %28 = vector.broadcast %cst_6 : f32 to vector<16x128xf32>
    %29 = arith.subf %28, %25 : vector<16x128xf32>
    %30 = arith.select %16, %25, %29 : vector<16x128xi1>, vector<16x128xf32>
    %31 = math.log %30 : vector<16x128xf32>
    %cst_7 = arith.constant 1.000000e+00 : f32
    %32 = vector.broadcast %cst_7 : f32 to vector<16x128xf32>
    %33 = arith.subf %32, %27 : vector<16x128xf32>
    %34 = arith.mulf %33, %33 : vector<16x128xf32>
    %35 = arith.mulf %34, %34 : vector<16x128xf32>
    %36 = arith.mulf %29, %29 : vector<16x128xf32>
    %37 = arith.mulf %31, %36 : vector<16x128xf32>
    %38 = arith.mulf %37, %21 : vector<16x128xf32>
    %39 = arith.mulf %25, %25 : vector<16x128xf32>
    %40 = arith.mulf %31, %39 : vector<16x128xf32>
    %41 = arith.mulf %40, %35 : vector<16x128xf32>
    %42 = arith.mulf %41, %23 : vector<16x128xf32>
    %c0_i32 = arith.constant 0 : i32
    %43 = arith.cmpi eq, %arg1, %c0_i32 : i32
    %44 = arith.extui %43 : i1 to i32
    %c0_i32_8 = arith.constant 0 : i32
    %45 = arith.cmpi ne, %44, %c0_i32_8 : i32
    scf.if %45 {
      %cst_28 = arith.constant 0.000000e+00 : f32
      %70 = vector.broadcast %cst_28 : f32 to vector<3x128xf32>
      %c0_29 = arith.constant 0 : index
      %c0_30 = arith.constant 0 : index
      %c0_31 = arith.constant 0 : index
      %71 = vector.load %arg4[%c0_29, %c0_30, %c0_31] : memref<1x3x128xf32, #tpu.memory_space<vmem>>, vector<1x3x128xf32>
      %72 = vector.shape_cast %71 : vector<1x3x128xf32> to vector<3x128xf32>
      %73 = vector.shape_cast %70 : vector<3x128xf32> to vector<1x3x128xf32>
      tpu.vector_store %arg4[%c0_29, %c0_30, %c0_31], %73 {strides = array<i32>} : memref<1x3x128xf32, #tpu.memory_space<vmem>>, vector<1x3x128xf32>,
    } else {
    }
    %c0_9 = arith.constant 0 : index
    %c0_10 = arith.constant 0 : index
    %c0_11 = arith.constant 0 : index
    %46 = vector.load %arg4[%c0_9, %c0_10, %c0_11] : memref<1x3x128xf32, #tpu.memory_space<vmem>>, vector<1x1x128xf32>
    %47 = vector.shape_cast %46 : vector<1x1x128xf32> to vector<1x128xf32>
    %cst_12 = arith.constant dense<0.000000e+00> : vector<128xf32>
    %48 = vector.multi_reduction <add>, %38, %cst_12 [0] : vector<16x128xf32> to vector<128xf32>
    %49 = vector.shape_cast %48 : vector<128xf32> to vector<1x128xf32>
    %50 = arith.addf %47, %49 : vector<1x128xf32>
    %c0_13 = arith.constant 0 : index
    %c0_14 = arith.constant 0 : index
    %c0_15 = arith.constant 0 : index
    %51 = vector.load %arg4[%c0_13, %c0_14, %c0_15] : memref<1x3x128xf32, #tpu.memory_space<vmem>>, vector<1x1x128xf32>
    %52 = vector.shape_cast %51 : vector<1x1x128xf32> to vector<1x128xf32>
    %53 = vector.shape_cast %50 : vector<1x128xf32> to vector<1x1x128xf32>
    tpu.vector_store %arg4[%c0_13, %c0_14, %c0_15], %53 {strides = array<i32>} : memref<1x3x128xf32, #tpu.memory_space<vmem>>, vector<1x1x128xf32>,
    %c0_16 = arith.constant 0 : index
    %c1 = arith.constant 1 : index
    %c0_17 = arith.constant 0 : index
    %54 = vector.load %arg4[%c0_16, %c1, %c0_17] : memref<1x3x128xf32, #tpu.memory_space<vmem>>, vector<1x1x128xf32>
    %55 = vector.shape_cast %54 : vector<1x1x128xf32> to vector<1x128xf32>
    %cst_18 = arith.constant dense<0.000000e+00> : vector<128xf32>
    %56 = vector.multi_reduction <add>, %42, %cst_18 [0] : vector<16x128xf32> to vector<128xf32>
    %57 = vector.shape_cast %56 : vector<128xf32> to vector<1x128xf32>
    %58 = arith.addf %55, %57 : vector<1x128xf32>
    %c0_19 = arith.constant 0 : index
    %c1_20 = arith.constant 1 : index
    %c0_21 = arith.constant 0 : index
    %59 = vector.load %arg4[%c0_19, %c1_20, %c0_21] : memref<1x3x128xf32, #tpu.memory_space<vmem>>, vector<1x1x128xf32>
    %60 = vector.shape_cast %59 : vector<1x1x128xf32> to vector<1x128xf32>
    %61 = vector.shape_cast %58 : vector<1x128xf32> to vector<1x1x128xf32>
    tpu.vector_store %arg4[%c0_19, %c1_20, %c0_21], %61 {strides = array<i32>} : memref<1x3x128xf32, #tpu.memory_space<vmem>>, vector<1x1x128xf32>,
    %c0_22 = arith.constant 0 : index
    %c2 = arith.constant 2 : index
    %c0_23 = arith.constant 0 : index
    %62 = vector.load %arg4[%c0_22, %c2, %c0_23] : memref<1x3x128xf32, #tpu.memory_space<vmem>>, vector<1x1x128xf32>
    %63 = vector.shape_cast %62 : vector<1x1x128xf32> to vector<1x128xf32>
    %cst_24 = arith.constant dense<0.000000e+00> : vector<128xf32>
    %64 = vector.multi_reduction <add>, %21, %cst_24 [0] : vector<16x128xf32> to vector<128xf32>
    %65 = vector.shape_cast %64 : vector<128xf32> to vector<1x128xf32>
    %66 = arith.addf %63, %65 : vector<1x128xf32>
    %c0_25 = arith.constant 0 : index
    %c2_26 = arith.constant 2 : index
    %c0_27 = arith.constant 0 : index
    %67 = vector.load %arg4[%c0_25, %c2_26, %c0_27] : memref<1x3x128xf32, #tpu.memory_space<vmem>>, vector<1x1x128xf32>
    %68 = vector.shape_cast %67 : vector<1x1x128xf32> to vector<1x128xf32>
    %69 = vector.shape_cast %66 : vector<1x128xf32> to vector<1x1x128xf32>
    tpu.vector_store %arg4[%c0_25, %c2_26, %c0_27], %69 {strides = array<i32>} : memref<1x3x128xf32, #tpu.memory_space<vmem>>, vector<1x1x128xf32>,
    return
  }
  func.func @transform_0(%arg0: i32, %arg1: i32) -> (i32, i32) {
    %c1_i32 = arith.constant 1 : i32
    %0 = arith.muli %arg0, %c1_i32 : i32
    %1 = arith.addi %0, %arg1 : i32
    %c0_i32 = arith.constant 0 : i32
    %2 = arith.minsi %1, %c0_i32 : i32
    %c0_i32_0 = arith.constant 0 : i32
    %c0_i32_1 = arith.constant 0 : i32
    return %2, %c0_i32_0 : i32, i32
  }
  func.func @transform_1(%arg0: i32, %arg1: i32) -> (i32, i32) {
    %c1_i32 = arith.constant 1 : i32
    %0 = arith.muli %arg0, %c1_i32 : i32
    %1 = arith.addi %0, %arg1 : i32
    %c0_i32 = arith.constant 0 : i32
    %2 = arith.minsi %1, %c0_i32 : i32
    %c0_i32_0 = arith.constant 0 : i32
    %c0_i32_1 = arith.constant 0 : i32
    return %2, %c0_i32_0 : i32, i32
  }
  func.func @transform_2(%arg0: i32, %arg1: i32) -> (i32, i32, i32) {
    %c0_i32 = arith.constant 0 : i32
    %c0_i32_0 = arith.constant 0 : i32
    %c0_i32_1 = arith.constant 0 : i32
    return %arg0, %c0_i32, %c0_i32_0 : i32, i32, i32
  }
}

</mosaic_0001>

<bundles_post_ra>
// kernel: tpu_custom_call.1
= control target key start
LH: loop header
LB: loop body
LE: loop exit
PB: predicated region body
PF: predicated region fallthrough
CT: control target
= control target key end

     0   :  { %7 = vsyncpa [#allocation3], 0  ;;  %s296_s0 = inlined_call_operand.hbm [shape: f32[16,128], index: 0, kind: input, shape index: {}]   ;;  %s297_s1 = inlined_call_operand.hbm [shape: f32[16,128], index: 1, kind: input, shape index: {}]   ;;  %s298_s2 = inlined_call_operand.vmem [shape: f32[1,3,128], index: 2, kind: output, shape index: {}]  }
   0x1   :  { %s19_s11 = sshll.u32 %s296_s0, 4  ;;  %s20_s11 = int_to_ptr.hbm [resolvable:$true] %s19_s11 }
   0x2   :  { %8 = vsyncpa [#allocation5], 0  ;;  %s241_s12 = smov [#allocation2]   ;;  %s38_s16 = sshll.u32 %s297_s1, 4  ;;  %s39_s16 = int_to_ptr.hbm [resolvable:$true] %s38_s16 }
   0x3   :  { %s21_s13 = sshll.u32 %s241_s12, 4  ;;  %s242_s17 = smov 128   ;;  %s22_s13 = int_to_ptr.vmem [resolvable:$true] %s21_s13 }
   0x4   :  { %s243_s18 = smov 8   ;;  %s244_s19 = smov [#allocation4]  }
   0x5   :  { %27 = dma.hbm_to_vmem [thread:$0]  %s20_s11, 256, %s22_s13, [#allocation3], %s242_s17, %s242_s17, %s243_s18  }
   0x6   :  { %s40_s20 = sshll.u32 %s244_s19, 4  ;;  %s41_s20 = int_to_ptr.vmem [resolvable:$true] %s40_s20 }
   0x7   :  { %46 = dma.hbm_to_vmem [thread:$0]  %s39_s16, 256, %s41_s20, [#allocation5], %s242_s17, %s242_s17, %s243_s18  }
   0x8   :  { %237 = dma.done.wait [#allocation3], 256  }
   0x9   :  { %238 = vsyncadd [#allocation3], 4294967040 }
   0xa   :  { %239 = dma.done.wait [#allocation5], 256  }
   0xb   :  { %240 = vsyncadd [#allocation5], 4294967040  ;;  %v68_v0 = vlaneseq  ;;  %v245_v1 = vmov 0.0   ;;  %v63_v8 = vld [vmem:[#allocation2] sm:$0xff]  ;;  %v65_v9 = vld [vmem:[#allocation4] sm:$0xff] }
   0xc   :  { %135 = vst [vmem:[%s298_s2] sm:$0x7] %v245_v1  ;;  %v64_v10 = vld [vmem:[#allocation2 + $0x8] sm:$0xff]  ;;  %v66_v11 = vld [vmem:[#allocation4 + $0x8] sm:$0xff]  ;;  %vm83_vm1 = vcmp.eq.f32.partialorder %v65_v9, 1.0  ;;  %vm87_vm6 = vcmp.lt.f32.partialorder %v65_v9, 1.0 }
   0xd   :  { %v69_v2 = vshrl.u32 %v68_v0, 7  ;;  %v72_v3 = vand.u32 127, %v68_v0  ;;  %vm84_vm2 = vcmp.eq.f32.partialorder %v66_v11, 1.0  ;;  %vm88_vm7 = vcmp.lt.f32.partialorder %v66_v11, 1.0 }
   0xf   :  { %v70_v4 = vadd.s32 8, %v69_v2  ;;  %v77_v5 = vmul.u32 128, %v69_v2 }
  0x11   :  { %v78_v6 = vmul.u32 128, %v70_v4  ;;  %v79_v7 = vadd.s32 %v77_v5, %v72_v3 }
  0x13   :  { %v80_v12 = vadd.s32 %v78_v6, %v72_v3  ;;  %vm81_vm0 = vcmp.lt.s32.totalorder %v79_v7, 2048  ;;  %v156_v54 = vld [vmem:[%s298_s2 + $0x2] sm:$0x1]  ;;  %v136_v5 = vld [vmem:[%s298_s2] sm:$0x1] }
  0x14   :  { %vm85_vm3 = vmand %vm83_vm1, %vm81_vm0  ;;  %v99_v13 = vsel %vm81_vm0, %v63_v8, 0.5  ;;  %v101_v14 = vsel %vm81_vm0, %v65_v9, 2.0  ;;  %v146_v8 = vld [vmem:[%s298_s2 + $0x1] sm:$0x1] }
  0x15   :  { %vm82_vm4 = vcmp.lt.s32.totalorder %v80_v12, 2048  ;;  %v103_v15 = vsub.f32 1.0, %v99_v13  ;;  %v111_v20 = vsub.f32 1.0, %v101_v14  ;;  %v176_v21 = vsel %vm85_vm3, 1.0, %v245_v1  ;;  %vm89_vm8 = vmand %vm87_vm6, %vm81_vm0 }
  0x16   :  { %vm86_vm5 = vmand %vm84_vm2, %vm82_vm4  ;;  %v100_v16 = vsel %vm82_vm4, %v64_v10, 0.5  ;;  %v102_v17 = vsel %vm82_vm4, %v66_v11, 2.0  ;;  %v123_v30 = vmul.f32 %v99_v13, %v99_v13  ;;  %v178_v43 = vsel %vm89_vm8, 1.0, %v245_v1 }
  0x17   :  { %v104_v18 = vsub.f32 1.0, %v100_v16  ;;  %v105_v19 = vsel %vm85_vm3, %v99_v13, %v103_v15  ;;  %v177_v22 = vsel %vm86_vm5, 1.0, %v245_v1  ;;  %v112_v24 = vsub.f32 1.0, %v102_v17  ;;  %vm90_vm9 = vmand %vm88_vm7, %vm82_vm4 }
  0x18   :  { %185 = vlog2.f32 %v105_v19  ;;  %v157_v25 = vadd.f32 %v177_v22, %v176_v21  ;;  %v113_v26 = vmul.f32 %v111_v20, %v111_v20  ;;  %v117_v29 = vmul.f32 %v103_v15, %v103_v15 }
  0x19   :  { %v106_v23 = vsel %vm86_vm5, %v100_v16, %v104_v18  ;;  %v114_v28 = vmul.f32 %v112_v24, %v112_v24  ;;  %v118_v35 = vmul.f32 %v104_v18, %v104_v18  ;;  %v124_v36 = vmul.f32 %v100_v16, %v100_v16 }
  0x1a   :  { %187 = vlog2.f32 %v106_v23  ;;  %v158_v27 = vrot.slane %v157_v25, 4  ;;  %v115_v34 = vmul.f32 %v113_v26, %v113_v26  ;;  %v179_v49 = vsel %vm90_vm9, 1.0, %v245_v1 }
  0x1b   :  { %v116_v40 = vmul.f32 %v114_v28, %v114_v28 }
  0x1c   :  { %v159_v32 = vadd.f32 %v158_v27, %v157_v25 }
  0x1e   :  { %v186_v31 = vpop.eup %185  ;;  %v160_v38 = vrot.slane %v159_v32, 2 }
  0x1f   :  { %v108_v33 = vmul.f32 0.6931472, %v186_v31 }
  0x20   :  { %v188_v37 = vpop.eup %187  ;;  %v161_v44 = vadd.f32 %v160_v38, %v159_v32 }
  0x21   :  { %v110_v39 = vmul.f32 0.6931472, %v188_v37  ;;  %v119_v41 = vmul.f32 %v117_v29, %v108_v33  ;;  %v125_v42 = vmul.f32 %v123_v30, %v108_v33 }
  0x22   :  { %v162_v50 = vrot.slane %v161_v44, 1 }
  0x23   :  { %v120_v45 = vmul.f32 %v118_v35, %v110_v39  ;;  %v121_v46 = vmul.f32 %v176_v21, %v119_v41  ;;  %v126_v47 = vmul.f32 %v124_v36, %v110_v39  ;;  %v127_v48 = vmul.f32 %v125_v42, %v115_v34 }
  0x24   :  { %v163_v55 = vadd.f32 %v162_v50, %v161_v44 }
  0x25   :  { %v122_v51 = vmul.f32 %v177_v22, %v120_v45  ;;  %v128_v52 = vmul.f32 %v126_v47, %v116_v40  ;;  %v129_v53 = vmul.f32 %v178_v43, %v127_v48 }
  0x26   :  { %v164_v58 = vadd.f32 %v163_v55, %v156_v54 }
  0x27   :  { %v130_v56 = vmul.f32 %v179_v49, %v128_v52  ;;  %v137_v57 = vadd.f32 %v122_v51, %v121_v46 }
  0x28   :  { %165 = vst [vmem:[%s298_s2 + $0x2] sm:$0x1] %v164_v58 }
  0x29   :  { %v138_v59 = vrot.slane %v137_v57, 4  ;;  %v147_v60 = vadd.f32 %v130_v56, %v129_v53 }
  0x2b   :  { %v139_v61 = vadd.f32 %v138_v59, %v137_v57  ;;  %v148_v62 = vrot.slane %v147_v60, 4 }
  0x2d   :  { %v140_v63 = vrot.slane %v139_v61, 2  ;;  %v149_v0 = vadd.f32 %v148_v62, %v147_v60 }
  0x2f   :  { %v141_v1 = vadd.f32 %v140_v63, %v139_v61  ;;  %v150_v2 = vrot.slane %v149_v0, 2 }
  0x31   :  { %v142_v3 = vrot.slane %v141_v1, 1  ;;  %v151_v4 = vadd.f32 %v150_v2, %v149_v0 }
  0x33   :  { %v143_v6 = vadd.f32 %v142_v3, %v141_v1  ;;  %v152_v7 = vrot.slane %v151_v4, 1 }
  0x35   :  { %v144_v9 = vadd.f32 %v143_v6, %v136_v5  ;;  %v153_v10 = vadd.f32 %v152_v7, %v151_v4 }
  0x37   :  { %145 = vst [vmem:[%s298_s2] sm:$0x1] %v144_v9  ;;  %v154_v11 = vadd.f32 %v153_v10, %v146_v8 }
  0x39   :  { %155 = vst [vmem:[%s298_s2 + $0x1] sm:$0x1] %v154_v11 }
  0x3a   :  { %170 = vsyncpa [#allocation3], 1 }
  0x3b   :  { %171 = vsyncpa [#allocation5], 1 }

</bundles_post_ra>
